<compile_context>
chip_gen: v7x
topology: tpu7x:2x2x1
jax: 0.10.0
libtpu: 0.0.40
codegen_flags: <defaults>
</compile_context>

<pallas_src>
import jax
import jax.numpy as jnp
from jax.experimental import pallas as pl
from jax.experimental.pallas import tpu as pltpu


# ----------------------------- tiling helpers ------------------------------ #

_RESIDENT_TABLE_BYTES = 4 << 20   # keep the (V, E) table in VMEM when <= 4 MiB
_MAX_OUT_BLOCK_BYTES = 4 << 20    # out-block cap safe for v7x's 64 MiB VMEM
_MAX_GATHER_ROWS = 256            # cap outstanding per-row gathers per tile
_TARGET_M_ROWS = 512              # stop growing the batch tile past this M


def _pick_vocab_tile(V):
    """Lane-dense vocab tile: full V when small, else a 128-multiple divisor."""
    if V <= 512:
        return V
    if V % 1024 == 0 and V > 1024:
        return 1024
    for tv in (512, 256, 128):
        if V % tv == 0:
            return tv
    return V  # fall back: no vocab tiling (still correct)


def _pick_batch_tile(B, gather_rows_per_b, out_rows_per_b, tv):
    """Largest divisor of B with bounded gather / output-block footprint, while
    leaving >= 2 batch grid steps so the parallel axis can feed both v7x cores."""
    cap = B if B < 2 else B // 2
    best = 1
    for d in range(1, cap + 1):
        if B % d:
            continue
        if d * gather_rows_per_b > _MAX_GATHER_ROWS:
            break
        if d * out_rows_per_b * tv * 4 > _MAX_OUT_BLOCK_BYTES:
            break
        best = d
        if d * out_rows_per_b >= _TARGET_M_ROWS:
            break
    return best


def _vmem_limit_bytes(*block_bytes):
    """Scoped-VMEM limit from the real footprint, with headroom, capped for v7x."""
    total = sum(block_bytes)
    return int(min(max(4 * total, 16 << 20), 48 << 20))


# ----------------------------- kernels ------------------------------------- #

def _make_cbow_kernel(Bb, N, S, E, TV, emb_resident):
    rows = Bb * N * S          # embedding rows gathered per batch tile
    chunk = Bb * S             # rows of the summed-context matmul

    def kernel(ids_sm, emb_ref, w_ref, b_ref, out_ref, gbuf, ctx_sc, *dma_sem):
        bi = pl.program_id(0)  # batch tile (parallel / megacore axis)
        vj = pl.program_id(1)  # vocab tile (arbitrary, innermost)

        # Gather + neighbour-sum once per batch tile; reused for every V tile.
        @pl.when(vj == 0)
        def _gather_and_sum():
            base = bi * rows

            if emb_resident:
                # Fast path: whole table resident in VMEM -> dynamic row copies,
                # zero DMA descriptors.  Destination rows are written n-major
                # (dst = n*Bb*S + bb*S + s) so the CBOW sum below is contiguous.
                @pl.loop(0, Bb)
                def _bb(bb):
                    @pl.loop(0, N)
                    def _n(n):
                        @pl.loop(0, S)
                        def _s(s):
                            t = (bb * N + n) * S + s
                            dst = n * chunk + bb * S + s
                            tok = ids_sm[base + t]
                            gbuf[pl.ds(dst, 1), :] = emb_ref[pl.ds(tok, 1), :]
            else:
                sem = dma_sem[0]
                # Large-vocab path: per-row HBM->VMEM DMA gather.  Nested
                # (bb, n, s) loops avoid per-row div/mod on the scalar unit.
                @pl.loop(0, Bb)
                def _bb(bb):
                    @pl.loop(0, N)
                    def _n(n):
                        @pl.loop(0, S)
                        def _s(s):
                            t = (bb * N + n) * S + s
                            dst = n * chunk + bb * S + s
                            tok = ids_sm[base + t]
                            pltpu.make_async_copy(
                                emb_ref.at[pl.ds(tok, 1)],
                                gbuf.at[pl.ds(dst, 1)],
                                sem).start()
                # ONE aggregated wait for all `rows` copies: the descriptor
                # spans rows*E elements, exactly the total outstanding bytes.
                pltpu.make_async_copy(emb_ref.at[pl.ds(0, rows)],
                                      gbuf.at[pl.ds(0, rows)],
                                      sem).wait()

            # CBOW: sum over the N neighbours -> (Bb*S, E) context rows.
            ctx = gbuf[pl.ds(0, chunk), :]
            for n in range(1, N):
                ctx = ctx + gbuf[pl.ds(n * chunk, chunk), :]
            ctx_sc[...] = ctx

        # fc for this vocab tile: (Bb*S, E) @ (E, TV) + (1, TV).
        # Single contiguous lane-dense store, no in-kernel reshape.
        out_ref[...] = (jnp.dot(ctx_sc[...], w_ref[...],
                                preferred_element_type=jnp.float32)
                        + b_ref[...])

    return kernel


def _make_skipgram_kernel(Bb, N, S, E, TV, R, emb_resident):
    rows = Bb * N * S

    def kernel(ids_sm, emb_ref, w_ref, b_ref, out_ref, gbuf, *dma_sem):
        bi = pl.program_id(0)  # batch tile
        vj = pl.program_id(1)  # vocab tile

        # Gather once per batch tile; reused for every vocab tile.
        @pl.when(vj == 0)
        def _gather():
            base = bi * rows
            if emb_resident:
                @pl.loop(0, rows)
                def _t(t):
                    tok = ids_sm[base + t]
                    gbuf[pl.ds(t, 1), :] = emb_ref[pl.ds(tok, 1), :]
            else:
                sem = dma_sem[0]

                @pl.loop(0, rows)
                def _t(t):
                    tok = ids_sm[base + t]
                    pltpu.make_async_copy(emb_ref.at[pl.ds(tok, 1)],
                                          gbuf.at[pl.ds(t, 1)],
                                          sem).start()
                pltpu.make_async_copy(emb_ref.at[pl.ds(0, rows)],
                                      gbuf.at[pl.ds(0, rows)],
                                      sem).wait()

        # fc ONCE per (batch tile, vocab tile); PyTorch's `.repeat(1, R, 1, 1)`
        # is realized by storing the same logits block R times (no replica grid
        # axis, no redundant matmuls, no HBM re-read of the logits).
        logits = (jnp.dot(gbuf[...], w_ref[...],
                          preferred_element_type=jnp.float32)
                  + b_ref[...]).reshape(Bb, N * S, TV)
        for r in range(R):
            out_ref[:, r, :, :] = logits

    return kernel


# ----------------------------- wrappers ------------------------------------ #

def word2vec_cbow(x, emb, w_fc, b_fc, *, batch_tile=None, vocab_tile=None,
                  torch_layout=True):
    """x: (B, N, S) int32.

    torch_layout=True  -> (B, V, 1, S)  exact PyTorch Word2Vec(CBOW, CE) output.
    torch_layout=False -> (B, S, V)     kernel-native lane-dense layout (a CE
                                        consumer should prefer this and skip
                                        the full-tensor transpose pass).
    """
    B, N, S = x.shape
    V, E = emb.shape
    TV = vocab_tile or _pick_vocab_tile(V)
    assert V % TV == 0
    Bb = batch_tile or _pick_batch_tile(B, N * S, S, TV)
    assert B % Bb == 0
    assert (Bb * S) % 8 == 0 or Bb * S == B * S, "CBOW out block needs Bb*S % 8 == 0"

    emb_resident = V * E * 4 <= _RESIDENT_TABLE_BYTES
    ids = x.reshape(-1).astype(jnp.int32)
    emb_f = emb.astype(jnp.float32)
    w_f = w_fc.astype(jnp.float32)
    b2 = b_fc.reshape(1, V).astype(jnp.float32)

    if emb_resident:
        emb_spec = pl.BlockSpec((V, E), lambda bi, vj, ids: (0, 0))   # table in VMEM
    else:
        emb_spec = pl.BlockSpec(memory_space=pl.ANY)                  # table in HBM

    scratch = [pltpu.VMEM((Bb * N * S, E), jnp.float32),   # gathered rows
               pltpu.VMEM((Bb * S, E), jnp.float32)]       # summed context
    if not emb_resident:
        scratch.append(pltpu.SemaphoreType.DMA)

    vmem_limit = _vmem_limit_bytes(
        (V * E * 4) if emb_resident else 0,
        2 * E * TV * 4, 2 * 8 * TV * 4, 2 * Bb * S * TV * 4,
        Bb * N * S * E * 4, Bb * S * E * 4)

    kernel = _make_cbow_kernel(Bb, N, S, E, TV, emb_resident)

    logits = pl.pallas_call(
        kernel,
        out_shape=jax.ShapeDtypeStruct((B * S, V), jnp.float32),
        grid_spec=pltpu.PrefetchScalarGridSpec(
            num_scalar_prefetch=1,                          # token ids -> SMEM
            grid=(B // Bb, V // TV),
            in_specs=[
                emb_spec,
                pl.BlockSpec((E, TV), lambda bi, vj, ids: (0, vj)),
                pl.BlockSpec((1, TV), lambda bi, vj, ids: (0, vj)),
            ],
            out_specs=pl.BlockSpec((Bb * S, TV), lambda bi, vj, ids: (bi, vj)),
            scratch_shapes=scratch,
        ),
        compiler_params=pltpu.CompilerParams(
            dimension_semantics=("parallel", "arbitrary"),
            vmem_limit_bytes=vmem_limit),
    )(ids, emb_f, w_f, b2)

    if not torch_layout:
        return logits.reshape(B, S, V)
    # PyTorch parity: (B, 1, S, V).permute(0, -1, 1, 2) -> (B, V, 1, S).
    return jnp.transpose(logits.reshape(B, 1, S, V), (0, 3, 1, 2))


def word2vec_skipgram(x, emb, w_fc, b_fc, context_size, *, batch_tile=None,
                      vocab_tile=None, torch_layout=True):
    """x: (B, N, S) int32.

    torch_layout=True  -> (B, V, (context_size-1)*N, S)   PyTorch parity.
    torch_layout=False -> (B, (context_size-1)*N, S, V)   lane-dense native.
    """
    assert context_size >= 2
    B, N, S = x.shape
    V, E = emb.shape
    R = context_size - 1
    TV = vocab_tile or _pick_vocab_tile(V)
    assert V % TV == 0
    Bb = batch_tile or _pick_batch_tile(B, N * S, R * N * S, TV)
    assert B % Bb == 0
    assert (N * S) % 8 == 0, "SkipGram output block needs N*S % 8 == 0"

    emb_resident = V * E * 4 <= _RESIDENT_TABLE_BYTES
    ids = x.reshape(-1).astype(jnp.int32)
    emb_f = emb.astype(jnp.float32)
    w_f = w_fc.astype(jnp.float32)
    b2 = b_fc.reshape(1, V).astype(jnp.float32)

    if emb_resident:
        emb_spec = pl.BlockSpec((V, E), lambda bi, vj, ids: (0, 0))
    else:
        emb_spec = pl.BlockSpec(memory_space=pl.ANY)

    scratch = [pltpu.VMEM((Bb * N * S, E), jnp.float32)]
    if not emb_resident:
        scratch.append(pltpu.SemaphoreType.DMA)

    vmem_limit = _vmem_limit_bytes(
        (V * E * 4) if emb_resident else 0,
        2 * E * TV * 4, 2 * 8 * TV * 4, 2 * Bb * R * N * S * TV * 4,
        Bb * N * S * E * 4)

    kernel = _make_skipgram_kernel(Bb, N, S, E, TV, R, emb_resident)

    out = pl.pallas_call(
        kernel,
        out_shape=jax.ShapeDtypeStruct((B, R, N * S, V), jnp.float32),
        grid_spec=pltpu.PrefetchScalarGridSpec(
            num_scalar_prefetch=1,
            grid=(B // Bb, V // TV),
            in_specs=[
                emb_spec,
                pl.BlockSpec((E, TV), lambda bi, vj, ids: (0, vj)),
                pl.BlockSpec((1, TV), lambda bi, vj, ids: (0, vj)),
            ],
            out_specs=pl.BlockSpec((Bb, R, N * S, TV),
                                   lambda bi, vj, ids: (bi, 0, 0, vj)),
            scratch_shapes=scratch,
        ),
        compiler_params=pltpu.CompilerParams(
            dimension_semantics=("parallel", "arbitrary"),
            vmem_limit_bytes=vmem_limit),
    )(ids, emb_f, w_f, b2)

    native = out.reshape(B, R * N, S, V)        # contiguous -> free reshape
    if not torch_layout:
        return native
    return jnp.transpose(native, (0, 3, 1, 2))  # (B, V, R*N, S)


# ----------------------------- reference (plain JAX) ------------------------ #

def ref_cbow(x, emb, w_fc, b_fc):
    e = emb[x]                                            # (B, N, S, E)
    y = e.sum(axis=1, keepdims=True)                      # (B, 1, S, E)
    y = jnp.einsum("bnse,ev->bnsv", y, w_fc,
                   precision=jax.lax.Precision.HIGHEST) + b_fc
    return jnp.transpose(y, (0, 3, 1, 2))


def ref_skipgram(x, emb, w_fc, b_fc, context_size):
    e = emb[x]                                            # (B, N, S, E)
    e = jnp.tile(e, (1, context_size - 1, 1, 1))
    y = jnp.einsum("bnse,ev->bnsv", e, w_fc,
                   precision=jax.lax.Precision.HIGHEST) + b_fc
    return jnp.transpose(y, (0, 3, 1, 2))


# ----------------------------- main ----------------------------------------- #

if __name__ == "__main__":
    B, N, S = 4, 4, 8          # batch, neighbor_size, #subsequence
    V, E = 1024, 32            # vocab_size, embed_dim
    CONTEXT_SIZE = 3
    PADDING_IDX = 0

    key = jax.random.PRNGKey(0)
    k_emb, k_w, k_b, k_x = jax.random.split(key, 4)

    # nn.Embedding: N(0, 1), padding_idx row zeroed.
    emb = jax.random.normal(k_emb, (V, E), dtype=jnp.float32)
    emb = emb.at[PADDING_IDX].set(0.0)
    # nn.Linear(E, V): uniform(-1/sqrt(E), 1/sqrt(E)); stored as (E, V) = weight.T.
    bound = 1.0 / (E ** 0.5)
    w_fc = jax.random.uniform(k_w, (E, V), jnp.float32, -bound, bound)
    b_fc = jax.random.uniform(k_b, (V,), jnp.float32, -bound, bound)

    x = jax.random.randint(k_x, (B, N, S), 0, V, dtype=jnp.int32)

    # CBOW + CE path (PyTorch layout).
    out_cbow = jax.block_until_ready(word2vec_cbow(x, emb, w_fc, b_fc))
    assert out_cbow.shape == (B, V, 1, S), out_cbow.shape
    ref_c = ref_cbow(x, emb, w_fc, b_fc)
    assert jnp.allclose(out_cbow, ref_c, atol=2e-3, rtol=2e-3), \
        float(jnp.abs(out_cbow - ref_c).max())

    # SkipGram + CE path (PyTorch layout).
    out_sg = jax.block_until_ready(
        word2vec_skipgram(x, emb, w_fc, b_fc, CONTEXT_SIZE))
    assert out_sg.shape == (B, V, N * (CONTEXT_SIZE - 1), S), out_sg.shape
    ref_s = ref_skipgram(x, emb, w_fc, b_fc, CONTEXT_SIZE)
    assert jnp.allclose(out_sg, ref_s, atol=2e-3, rtol=2e-3), \
        float(jnp.abs(out_sg - ref_s).max())

    # TODO(synk): Word2Vec.subsampling uses Bernoulli draws (training-time
    # stochastic op); not part of the deterministic forward path exercised here.
    print("KERNEL_OK")
</pallas_src>

<mosaic_0001>
module attributes {stable_mosaic.version = 11 : i64} {
  func.func @kernel(%arg0: i32, %arg1: i32, %arg2: memref<128xi32, #tpu.memory_space<smem>>, %arg3: memref<1024x32xf32, #tpu.memory_space<vmem>>, %arg4: memref<32x512xf32, #tpu.memory_space<vmem>>, %arg5: memref<1x512xf32, #tpu.memory_space<vmem>>, %arg6: memref<16x512xf32, #tpu.memory_space<vmem>>, %arg7: memref<64x32xf32, #tpu.memory_space<vmem>>, %arg8: memref<16x32xf32, #tpu.memory_space<vmem>>) attributes {dimension_semantics = [#tpu.dimension_semantics<parallel>, #tpu.dimension_semantics<arbitrary>], iteration_bounds = array<i64: 2, 2>, scalar_prefetch = 1 : i64, scratch_operands = 2 : i64, tpu.core_type = #tpu.core_type<tc>, window_params = [{pipeline_mode = #tpu.pipeline_mode<synchronous>, transform_indices = @transform_0, window_bounds = array<i64: 1024, 32>}, {transform_indices = @transform_1, window_bounds = array<i64: 32, 512>}, {transform_indices = @transform_2, window_bounds = array<i64: 1, 512>}, {transform_indices = @transform_3, window_bounds = array<i64: 16, 512>}]} {
    %c0_i32 = arith.constant 0 : i32
    %0 = arith.cmpi eq, %arg1, %c0_i32 : i32
    %1 = arith.extui %0 : i1 to i32
    %c0_i32_0 = arith.constant 0 : i32
    %2 = arith.cmpi ne, %1, %c0_i32_0 : i32
    scf.if %2 {
      %c64_i32 = arith.constant 64 : i32
      %10 = arith.muli %arg0, %c64_i32 : i32
      %c0_i32_8 = arith.constant 0 : i32
      %c2_i32 = arith.constant 2 : i32
      %11 = arith.addi %c0_i32_8, %c2_i32 : i32
      %c1_i32 = arith.constant 1 : i32
      scf.for %arg9 = %c0_i32_8 to %11 step %c1_i32  : i32 {
        %c1_i32_17 = arith.constant 1 : i32
        %20 = arith.muli %arg9, %c1_i32_17 : i32
        %c0_i32_18 = arith.constant 0 : i32
        %21 = arith.addi %c0_i32_18, %20 : i32
        %c0_i32_19 = arith.constant 0 : i32
        %c4_i32 = arith.constant 4 : i32
        %22 = arith.addi %c0_i32_19, %c4_i32 : i32
        %c1_i32_20 = arith.constant 1 : i32
        scf.for %arg10 = %c0_i32_19 to %22 step %c1_i32_20  : i32 {
          %c1_i32_22 = arith.constant 1 : i32
          %23 = arith.muli %arg10, %c1_i32_22 : i32
          %c0_i32_23 = arith.constant 0 : i32
          %24 = arith.addi %c0_i32_23, %23 : i32
          %c0_i32_24 = arith.constant 0 : i32
          %c8_i32 = arith.constant 8 : i32
          %25 = arith.addi %c0_i32_24, %c8_i32 : i32
          %c1_i32_25 = arith.constant 1 : i32
          scf.for %arg11 = %c0_i32_24 to %25 step %c1_i32_25  : i32 {
            %c1_i32_27 = arith.constant 1 : i32
            %26 = arith.muli %arg11, %c1_i32_27 : i32
            %c0_i32_28 = arith.constant 0 : i32
            %27 = arith.addi %c0_i32_28, %26 : i32
            %c4_i32_29 = arith.constant 4 : i32
            %28 = arith.muli %21, %c4_i32_29 : i32
            %29 = arith.addi %28, %24 : i32
            %c8_i32_30 = arith.constant 8 : i32
            %30 = arith.muli %29, %c8_i32_30 : i32
            %31 = arith.addi %30, %27 : i32
            %c16_i32 = arith.constant 16 : i32
            %32 = arith.muli %24, %c16_i32 : i32
            %c8_i32_31 = arith.constant 8 : i32
            %33 = arith.muli %21, %c8_i32_31 : i32
            %34 = arith.addi %32, %33 : i32
            %35 = arith.addi %34, %27 : i32
            %36 = arith.addi %10, %31 : i32
            %37 = arith.index_cast %36 : i32 to index
            %38 = memref.load %arg2[%37] : memref<128xi32, #tpu.memory_space<smem>>
            %39 = arith.index_cast %38 : i32 to index
            %c0_32 = arith.constant 0 : index
            %40 = vector.load %arg3[%39, %c0_32] : memref<1024x32xf32, #tpu.memory_space<vmem>>, vector<1x32xf32>
            %41 = arith.index_cast %35 : i32 to index
            %c0_33 = arith.constant 0 : index
            %42 = vector.load %arg7[%41, %c0_33] : memref<64x32xf32, #tpu.memory_space<vmem>>, vector<1x32xf32>
            tpu.vector_store %arg7[%41, %c0_33], %40 {strides = array<i32>} : memref<64x32xf32, #tpu.memory_space<vmem>>, vector<1x32xf32>,
          }
          %c8_i32_26 = arith.constant 8 : i32
        }
        %c4_i32_21 = arith.constant 4 : i32
      }
      %c2_i32_9 = arith.constant 2 : i32
      %c0_10 = arith.constant 0 : index
      %c0_11 = arith.constant 0 : index
      %12 = vector.load %arg7[%c0_10, %c0_11] : memref<64x32xf32, #tpu.memory_space<vmem>>, vector<16x32xf32>
      %c16 = arith.constant 16 : index
      %c0_12 = arith.constant 0 : index
      %13 = vector.load %arg7[%c16, %c0_12] : memref<64x32xf32, #tpu.memory_space<vmem>>, vector<16x32xf32>
      %14 = arith.addf %12, %13 : vector<16x32xf32>
      %c32 = arith.constant 32 : index
      %c0_13 = arith.constant 0 : index
      %15 = vector.load %arg7[%c32, %c0_13] : memref<64x32xf32, #tpu.memory_space<vmem>>, vector<16x32xf32>
      %16 = arith.addf %14, %15 : vector<16x32xf32>
      %c48 = arith.constant 48 : index
      %c0_14 = arith.constant 0 : index
      %17 = vector.load %arg7[%c48, %c0_14] : memref<64x32xf32, #tpu.memory_space<vmem>>, vector<16x32xf32>
      %18 = arith.addf %16, %17 : vector<16x32xf32>
      %c0_15 = arith.constant 0 : index
      %c0_16 = arith.constant 0 : index
      %19 = vector.load %arg8[%c0_15, %c0_16] : memref<16x32xf32, #tpu.memory_space<vmem>>, vector<16x32xf32>
      tpu.vector_store %arg8[%c0_15, %c0_16], %18 {strides = array<i32>} : memref<16x32xf32, #tpu.memory_space<vmem>>, vector<16x32xf32>,
    } else {
    }
    %c0 = arith.constant 0 : index
    %c0_1 = arith.constant 0 : index
    %3 = vector.load %arg8[%c0, %c0_1] : memref<16x32xf32, #tpu.memory_space<vmem>>, vector<16x32xf32>
    %c0_2 = arith.constant 0 : index
    %c0_3 = arith.constant 0 : index
    %4 = vector.load %arg4[%c0_2, %c0_3] : memref<32x512xf32, #tpu.memory_space<vmem>>, vector<32x512xf32>
    %cst = arith.constant dense<0.000000e+00> : vector<16x512xf32>
    %5 = tpu.matmul %3, %4, %cst {dimension_numbers = #tpu.dot_dimension_numbers<[1], [0], [0], [1], [0, 0, 1, 1], [], []>} : vector<16x32xf32>, vector<32x512xf32>, vector<16x512xf32> -> vector<16x512xf32>
    %c0_4 = arith.constant 0 : index
    %c0_5 = arith.constant 0 : index
    %6 = vector.load %arg5[%c0_4, %c0_5] : memref<1x512xf32, #tpu.memory_space<vmem>>, vector<1x512xf32>
    %7 = vector.broadcast %6 : vector<1x512xf32> to vector<16x512xf32>
    %8 = arith.addf %5, %7 : vector<16x512xf32>
    %c0_6 = arith.constant 0 : index
    %c0_7 = arith.constant 0 : index
    %9 = vector.load %arg6[%c0_6, %c0_7] : memref<16x512xf32, #tpu.memory_space<vmem>>, vector<16x512xf32>
    tpu.vector_store %arg6[%c0_6, %c0_7], %8 {strides = array<i32>} : memref<16x512xf32, #tpu.memory_space<vmem>>, vector<16x512xf32>,
    return
  }
  func.func @transform_0(%arg0: i32, %arg1: i32, %arg2: memref<128xi32, #tpu.memory_space<smem>>) -> (i32, i32) {
    %c0_i32 = arith.constant 0 : i32
    %c0_i32_0 = arith.constant 0 : i32
    %c0_i32_1 = arith.constant 0 : i32
    return %c0_i32, %c0_i32_0 : i32, i32
  }
  func.func @transform_1(%arg0: i32, %arg1: i32, %arg2: memref<128xi32, #tpu.memory_space<smem>>) -> (i32, i32) {
    %c0_i32 = arith.constant 0 : i32
    %c0_i32_0 = arith.constant 0 : i32
    return %c0_i32, %arg1 : i32, i32
  }
  func.func @transform_2(%arg0: i32, %arg1: i32, %arg2: memref<128xi32, #tpu.memory_space<smem>>) -> (i32, i32) {
    %c0_i32 = arith.constant 0 : i32
    %c0_i32_0 = arith.constant 0 : i32
    return %c0_i32, %arg1 : i32, i32
  }
  func.func @transform_3(%arg0: i32, %arg1: i32, %arg2: memref<128xi32, #tpu.memory_space<smem>>) -> (i32, i32) {
    %c0_i32 = arith.constant 0 : i32
    return %arg0, %arg1 : i32, i32
  }
}

</mosaic_0001>

<bundles_post_ra>
// kernel: tpu_custom_call.1
= control target key start
LH: loop header
LB: loop body
LE: loop exit
PB: predicated region body
PF: predicated region fallthrough
CT: control target
= control target key end

     0   :  { %s1259_s0 = inlined_call_operand.vmem [shape: s32[128], index: 0, kind: input, shape index: {}]   ;;  %s1260_s1 = inlined_call_operand.vmem [shape: f32[1024,32], index: 1, kind: input, shape index: {}]   ;;  %s1261_s2 = inlined_call_operand.vmem [shape: f32[32,1024], index: 2, kind: input, shape index: {}]   ;;  %s1262_s3 = inlined_call_operand.vmem [shape: f32[1,1024], index: 3, kind: input, shape index: {}]   ;;  %s1263_s4 = inlined_call_operand.hbm [shape: f32[32,1024], index: 4, kind: output, shape index: {}]  }
   0x1   :  { %1271 = sst [smem:[#allocation19_spill]] %s1261_s2  ;;  %s9_s17 = sshll.u32 %s1259_s0, 4  ;;  %s10_s17 = int_to_ptr.vmem [resolvable:$true] %s9_s17 }
   0x2   :  { %s817_s18 = scalar_lea.vmem %s10_s17, 16  ;;  %p822_p1 = scmp.lt.s32.totalorder %s10_s17, %s10_s17 }
   0x3   :  { %p818_p0 = scmp.ne.s32.totalorder %s10_s17, %s817_s18  ;;  %p823_p2 = scmp.lt.s32.totalorder %s817_s18, %s817_s18 }
   0x5   :  { %p824_p3 = por %p823_p2, %p822_p1 }
   0x7   :  { %p825_p4 = pnand %p824_p3, %p818_p0 }
   0x9   :  { %828 = shalt.err (!%p825_p4)  }
   0xa   :  { %s967_s19 = smov [#allocation5]  }
   0xb   :  { %12 = dma.vmem_to_smem %s10_s17, 16, %s967_s19, [#allocation4] }
   0xc   :  { %909 = dma.done.wait [#allocation4], 16 }
   0xd   :  { %910 = vsyncadd [#allocation4], 4294967280 }
   0xe   :  { %14 = sfence }
   0xf   :  { %15 = vsyncpa [#allocation8], 0 }
  0x10   :  { %17 = vsyncpa [#allocation8 + $0x1], 0  ;;  %s1001_s20 = smov 0   ;;  %s1003_s21 = smov 0  }
  0x11   :  { %s1005_s0 = smov 0   ;;  %s1007_s22 = smov 0  }
  0x12   :  { %s1009_s23 = smov 0   ;;  %s1011_s24 = smov 0  }
  0x13   :  { %s1013_s25 = smov 0   ;;  %s1015_s26 = smov 0  }
  0x14   :  { %s1017_s27 = smov 0   ;;  %s1019_s28 = smov 0  }
  0x15 LB: > { %1272 = sst [smem:[#allocation11_spill]] %s925_s0  ;;  %s655_s29 = sadd.s32 4294967295, %s953_s28   ;;  %s953_s28 = sphi %s1019_s28, %s23_s28   ;;  %s949_s27 = sphi %s1017_s27, %s1297_s27   ;;  %s945_s26 = sphi %s1015_s26, %s1293_s26   ;;  %s941_s25 = sphi %s1013_s25, %s1292_s25   ;;  %s937_s24 = sphi %s1011_s24, %s1291_s24   ;;  %s933_s23 = sphi %s1009_s23, %s1290_s23   ;;  %s929_s22 = sphi %s1007_s22, %s1289_s22   ;;  %s925_s0 = sphi %s1005_s0, %s1288_s0   ;;  %s921_s21 = sphi %s1003_s21, %s1296_s21   ;;  %s917_s20 = sphi %s1001_s20, %s1295_s20  }
  0x16   : > { %1273 = sst [smem:[#allocation12_spill]] %s933_s23  ;;  %s656_s30 = sadd.s32 4294967294, %s953_s28  }
  0x17   : > { %1274 = sst [smem:[#allocation13_spill]] %s945_s26  ;;  %s32_s5 = sadd.s32 1, %s945_s26 }
  0x18   : > { %1275 = sst [smem:[#allocation14_spill]] %s949_s27  ;;  %s35_s6 = sadd.s32 1, %s949_s27 }
  0x19   : > { %p33_p5 = scmp.ge.s32.totalorder %s32_s5, 2  ;;  %s63_s7 = sadd.s32 1, %s933_s23 }
  0x1a   : > { %p70_p6 = scmp.ne.s32.totalorder %s933_s23, %s929_s22  ;;  %p71_p7 = scmp.eq.s32.totalorder %s953_s28, 0 }
  0x1b   : > { %s1299_s5 = smov (%p33_p5, %s32_s5), 0  ;;  %s1301_s6 = smov (!%p33_p5, %s35_s6), %s949_s27 }
  0x1c   : > { %1276 = sst [smem:[#allocation15_spill]] %s1299_s5  ;;  %s60_s8 = ssub.s32 %s945_s26, %s1299_s5 }
  0x1d   : > { %p1064_p8 = por %p71_p7, %p70_p6  ;;  %p37_p9 = scmp.ge.s32.totalorder %s1301_s6, 2 }
  0x1e   : > { %p61_p10 = scmp.eq.s32.totalorder %s60_s8, 0  ;;  %s117_s10 = sadd.s32 1, %s925_s0 }
  0x1f   : > { %p127_p11 = scmp.ne.s32.totalorder %s925_s0, %s921_s21  ;;  %s1303_s6 = smov (%p37_p9, %s1301_s6), 0 }
  0x20   : > { %1278 = sst [smem:[#allocation16_spill]] %s1303_s6  ;;  %s112_s12 = ssub.s32 %s949_s27, %s1303_s6 }
  0x21   : > { %s1074_s11 = scalar_select %p61_p10, %s933_s23, %s63_s7  }
  0x22   : > { %p128_p12 = scmp.eq.s32.totalorder %s655_s29, 3  ;;  %s114_s13 = sor.u32 %s112_s12, %s60_s8 }
  0x23   : > { %1279 = sst [smem:[#allocation17_spill]] %s1074_s11  ;;  %p133_p13 = scmp.ne.s32.totalorder %s921_s21, %s917_s20 }
  0x24   : > { %p115_p0 = scmp.eq.s32.totalorder %s114_s13, 0  ;;  %p1080_p1 = por %p128_p12, %p127_p11 }
  0x25   : > { %p134_p2 = scmp.eq.s32.totalorder %s656_s30, 3  ;;  %p658_p4 = scmp.ge.s32.totalorder %s953_s28, 4 }
  0x26   : > { %s1085_s15 = scalar_select %p115_p0, %s925_s0, %s117_s10  }
  0x27   : > { %p1087_p3 = por %p134_p2, %p133_p13  ;;  %153 = sbr.rel (%p658_p4) target bundleno = 64 (0x40), region = 20 }
  0x28   : > { %1281 = sst [smem:[#allocation18_spill]] %s1085_s15 }
  0x2e   : > { %156 = sbr.rel (!%p1064_p8) target bundleno = 64 (0x40), region = 24  ;;  %s158_s17 = sand.u32 (%p1064_p8), 1, %s933_s23  }
  0x2f   : > { %s683_s18 = sshll.u32 (%p1064_p8), %s945_s26, 5  ;;  %s659_s19 = sshll.u32 (%p1064_p8), %s158_s17, 7 }
  0x30   : > { %s1283_s2 = sld [smem:[#allocation19_spill]] (%p1064_p8)  ;;  %s160_s8 = scalar_lea.vmem (%p1064_p8), [#allocation6], %s659_s19 }
  0x36   : > { %s1099_s30 = scalar_lea.vmem %s1283_s2, %s683_s18 }
  0x37   : > { %v176_v0 = vld [vmem:[%s1099_s30] sm:$0xff]  ;;  %v178_v1 = vld [vmem:[%s1099_s30 + $0x8] sm:$0xff]  ;;  %v180_v2 = vld [vmem:[%s1099_s30 + $0x10] sm:$0xff] }
  0x38   : > { %177 = vst [vmem:[%s160_s8] sm:$0xff] %v176_v0  ;;  %179 = vst [vmem:[%s160_s8 + $0x8] sm:$0xff] %v178_v1  ;;  %v182_v3 = vld [vmem:[%s1099_s30 + $0x18] sm:$0xff]  ;;  %v184_v4 = vld [vmem:[%s1099_s30 + $0x40] sm:$0xff] }
  0x39   : > { %181 = vst [vmem:[%s160_s8 + $0x10] sm:$0xff] %v180_v2  ;;  %v186_v5 = vld [vmem:[%s1099_s30 + $0x48] sm:$0xff]  ;;  %183 = vst [vmem:[%s160_s8 + $0x18] sm:$0xff] %v182_v3  ;;  %v188_v6 = vld [vmem:[%s1099_s30 + $0x50] sm:$0xff] }
  0x3a   : > { %185 = vst [vmem:[%s160_s8 + $0x20] sm:$0xff] %v184_v4  ;;  %187 = vst [vmem:[%s160_s8 + $0x28] sm:$0xff] %v186_v5  ;;  %v190_v7 = vld [vmem:[%s1099_s30 + $0x58] sm:$0xff]  ;;  %v192_v8 = vld [vmem:[%s1099_s30 + $0x80] sm:$0xff] }
  0x3b   : > { %189 = vst [vmem:[%s160_s8 + $0x30] sm:$0xff] %v188_v6  ;;  %191 = vst [vmem:[%s160_s8 + $0x38] sm:$0xff] %v190_v7  ;;  %v194_v9 = vld [vmem:[%s1099_s30 + $0x88] sm:$0xff]  ;;  %v196_v10 = vld [vmem:[%s1099_s30 + $0x90] sm:$0xff] }
  0x3c   : > { %193 = vst [vmem:[%s160_s8 + $0x40] sm:$0xff] %v192_v8  ;;  %v198_v11 = vld [vmem:[%s1099_s30 + $0x98] sm:$0xff]  ;;  %195 = vst [vmem:[%s160_s8 + $0x48] sm:$0xff] %v194_v9  ;;  %v200_v12 = vld [vmem:[%s1099_s30 + $0xc0] sm:$0xff] }
  0x3d   : > { %197 = vst [vmem:[%s160_s8 + $0x50] sm:$0xff] %v196_v10  ;;  %199 = vst [vmem:[%s160_s8 + $0x58] sm:$0xff] %v198_v11  ;;  %v202_v13 = vld [vmem:[%s1099_s30 + $0xc8] sm:$0xff]  ;;  %v204_v14 = vld [vmem:[%s1099_s30 + $0xd0] sm:$0xff] }
  0x3e   : > { %201 = vst [vmem:[%s160_s8 + $0x60] sm:$0xff] %v200_v12  ;;  %203 = vst [vmem:[%s160_s8 + $0x68] sm:$0xff] %v202_v13  ;;  %v206_v15 = vld [vmem:[%s1099_s30 + $0xd8] sm:$0xff] }
  0x3f   : > { %205 = vst [vmem:[%s160_s8 + $0x70] sm:$0xff] %v204_v14  ;;  %207 = vst [vmem:[%s160_s8 + $0x78] sm:$0xff] %v206_v15 }
  0x40 PF: > { %p662_p5 = scmp.ge.s32.totalorder %s953_s28, 1  ;;  %p220_p6 = scmp.lt.s32.totalorder %s953_s28, 5 }
  0x42   : > { %p221_p7 = pnand %p662_p5, %p220_p6 }
  0x43   : > { %s227_s9 = sand.u32 (!%p221_p7), 1, %s929_s22   ;;  %s1264_s10 = sand.u32 (!%p221_p7), 1, %s921_s21  }
  0x44   : > { %224 = sbr.rel (%p221_p7) target bundleno = 365 (0x16d), region = 51  ;;  %s663_s12 = sshll.u32 (!%p221_p7), %s227_s9, 7 }
  0x45   : > { %s664_s13 = sshll.u32 (!%p221_p7), %s1264_s10, 6  ;;  %s1124_s17 = sshll.u32 (!%p221_p7), %s937_s24, 2 }
  0x46   : > { %p256_p8 = scmp.lt.s32.totalorder (!%p221_p7), %s1124_s17, 7  ;;  %s1134_s30 = scalar_lea.vmem (!%p221_p7), [#allocation6], %s663_s12 }
  0x47   : > { %s1136_s8 = scalar_lea.vmem (!%p221_p7), [#allocation7], %s664_s13  ;;  %p666_p9 = scmp.ne.s32.totalorder (!%p221_p7), %s937_s24, 0 }
  0x4b   : > { %s1128_s18 = scalar_select %p256_p8, %s1124_s17, 7 }
  0x4c   : > { %265 = sbr.rel (%p666_p9) target bundleno = 117 (0x75), region = 59  ;;  %s1140_s9 = smov (!%p666_p9), 0  }
  0x53 LB: >> { %s1145_s10 = smov 0   ;;  %s957_s9 = sphi %s1140_s9, %s272_s9  }
  0x54 LB: >>> { %s963_s12 = smov 0   ;;  %s961_s10 = sphi %s1145_s10, %s278_s10  }
  0x55 LB: >>>> { %s668_s24 = sshll.u32 %s957_s9, 2  ;;  %s670_s29 = sshll.u32 %s961_s10, 4  ;;  %vm298_vm0 = vcmask 253952   ;;  %s965_s12 = sphi %s963_s12, %s284_s12  }
  0x56   : >>>> { %s286_s13 = sadd.s32 %s961_s10, %s668_s24  ;;  %s671_s22 = sshll.u32 %s957_s9, 3 }
  0x57   : >>>> { %s669_s19 = sshll.u32 %s286_s13, 3  ;;  %s291_s2 = sadd.s32 %s671_s22, %s670_s29 }
  0x58   : >>>> { %s288_s7 = sadd.s32 %s965_s12, %s669_s19  ;;  %s1284_s6 = sshll.u32 %s941_s25, 6 }
  0x59   : >>>> { %s293_s5 = sadd.s32 %s1284_s6, %s288_s7  ;;  %s292_s26 = sadd.s32 %s965_s12, %s291_s2 }
  0x5a   : >>>> { %s294_s27 = sld [smem:[#allocation5 + %s293_s5]]  ;;  %s297_s0 = scalar_lea.vmem [#allocation2], %s292_s26 }
  0x5b   : >>>> { %s284_s12 = sadd.s32 1, %s965_s12  }
  0x5c   : >>>> { %p281_p10 = scmp.ge.s32.totalorder %s284_s12, 8  }
  0x5d   : >>> { %s278_s10 = sadd.s32 (%p281_p10), 1, %s961_s10  }
  0x5e   : >>> { %283 = sbr.rel (!%p281_p10) target bundleno = 85 (0x55), region = 125  ;;  %p275_p11 = scmp.ge.s32.totalorder (%p281_p10), %s278_s10, 4  }
  0x60   : >>>> { %s295_s15 = scalar_lea.vmem %s1260_s1, %s294_s27 }
  0x61   : >>>> { %v296_v16 = vld [vmem:[%s295_s15] sm:$0x1] }
  0x62   : >>>> { %299 = vst.msk [vmem:[%s297_s0] sm:$0x1] %vm298_vm0, %v296_v16 }
  0x65   : >> { %277 = sbr.rel (!%p275_p11) target bundleno = 84 (0x54), region = 136  ;;  %s272_s9 = sadd.s32 (%p275_p11), 1, %s957_s9  }
  0x66   : >> { %p269_p12 = scmp.ge.s32.totalorder (%p275_p11), %s272_s9, 2  }
  0x6c   : > { %271 = sbr.rel (!%p269_p12) target bundleno = 83 (0x53), region = 147  ;;  %v300_v17 = vld [vmem:[#allocation2] sm:$0xff] (%p269_p12)  ;;  %v302_v18 = vld [vmem:[#allocation2 + $0x10] sm:$0xff] (%p269_p12)  ;;  %v301_v21 = vld [vmem:[#allocation2 + $0x8] sm:$0xff] (%p269_p12)  ;;  %vm314_vm1 = vcmask (%p269_p12), 261120  }
  0x6d   : > { %v306_v19 = vld [vmem:[#allocation2 + $0x20] sm:$0xff] (%p269_p12)  ;;  %v304_v20 = vadd.f32 (%p269_p12), %v302_v18, %v300_v17  ;;  %v303_v22 = vld [vmem:[#allocation2 + $0x18] sm:$0xff] (%p269_p12)  ;;  %v310_v23 = vld [vmem:[#allocation2 + $0x30] sm:$0xff] (%p269_p12) }
  0x6e   : > { %v305_v24 = vadd.f32 (%p269_p12), %v303_v22, %v301_v21  ;;  %v307_v25 = vld [vmem:[#allocation2 + $0x28] sm:$0xff] (%p269_p12)  ;;  %v311_v27 = vld [vmem:[#allocation2 + $0x38] sm:$0xff] (%p269_p12) }
  0x6f   : > { %v308_v26 = vadd.f32 (%p269_p12), %v306_v19, %v304_v20 }
  0x70   : > { %v309_v28 = vadd.f32 (%p269_p12), %v307_v25, %v305_v24 }
  0x71   : > { %v312_v29 = vadd.f32 (%p269_p12), %v310_v23, %v308_v26 }
  0x72   : > { %v313_v30 = vadd.f32 (%p269_p12), %v311_v27, %v309_v28 }
  0x73   : > { %315 = vst.msk [vmem:[#allocation3] sm:$0xff] %vm314_vm1, %v312_v29 }
  0x74   : > { %316 = vst.msk [vmem:[#allocation3 + $0x8] sm:$0xff] %vm314_vm1, %v313_v30 }
  0x75 PF: > { %v320_v31 = vld [vmem:[%s1134_s30 + $0x8] sm:$0xff]  ;;  %v322_v33 = vld [vmem:[%s1134_s30 + $0x18] sm:$0xff]  ;;  %v319_v36 = vld [vmem:[%s1134_s30] sm:$0xff]  ;;  %v968_v38 = vmov 0.0   ;;  %vm357_vm2 = vcmask 261120   ;;  %v337_v58 = vlaneseq  ;;  %s1285_s23 = scalar_lea.vmem %s1262_s3, %s1128_s18  ;;  %s684_s26 = sshll.u32 %s941_s25, 4 }
  0x76   : > { %v324_v32 = vld [vmem:[%s1134_s30 + $0x28] sm:$0xff]  ;;  %v326_v35 = vld [vmem:[%s1134_s30 + $0x38] sm:$0xff]  ;;  %v323_v37 = vld [vmem:[%s1134_s30 + $0x20] sm:$0xff]  ;;  %428 = vmatprep.mubr.f32.mxu0 %v968_v38  ;;  %505 = vmatprep.mubr.f32.mxu1 %v968_v38  ;;  %s540_s27 = sadd.s32 %s684_s26, %s1124_s17  ;;  %s543_s25 = sshll.u32 %s1136_s8, 4  ;;  %s1193_s25 = int_to_ptr.vmem [resolvable:$true] %s543_s25 }
  0x77   : > { %v685_v34 = vpack.c.bf16 %v324_v32, %v320_v31  ;;  %v693_v39 = vpack.c.bf16 %v326_v35, %v322_v33  ;;  %v687_v40 = vpack.c.bf16 %v323_v37, %v319_v36  ;;  %v321_v41 = vld [vmem:[%s1134_s30 + $0x10] sm:$0xff]  ;;  %v328_v43 = vld [vmem:[%s1134_s30 + $0x48] sm:$0xff]  ;;  %v330_v46 = vld [vmem:[%s1134_s30 + $0x58] sm:$0xff]  ;;  %v338_v59 = vshrl.u32 %v337_v58, 7  ;;  %s680_s5 = sshll.u32 %s540_s27, 7  ;;  %s1286_s10 = sand.u32 1, %s921_s21  }
  0x78   : > { %v325_v42 = vld [vmem:[%s1134_s30 + $0x30] sm:$0xff]  ;;  %v332_v45 = vld [vmem:[%s1134_s30 + $0x68] sm:$0xff]  ;;  %v334_v47 = vld [vmem:[%s1134_s30 + $0x78] sm:$0xff]  ;;  %s1191_s15 = scalar_lea.hbm %s1263_s4, %s680_s5  ;;  %s1201_s17 = scalar_lea.sflag [#allocation8], %s1286_s10 }
  0x79   : > { %686 = vmatprep.subr.bf16.mxu0 %v685_v34  ;;  %v695_v44 = vpack.c.bf16 %v325_v42, %v321_v41  ;;  %694 = vmatprep.subr.bf16.mxu1 %v693_v39  ;;  %v689_v48 = vpack.c.bf16 %v332_v45, %v328_v43  ;;  %v697_v49 = vpack.c.bf16 %v334_v47, %v330_v46  ;;  %v327_v50 = vld [vmem:[%s1134_s30 + $0x40] sm:$0xff]  ;;  %v329_v52 = vld [vmem:[%s1134_s30 + $0x50] sm:$0xff]  ;;  %v339_v60 = vsub.s32 0, %v338_v59  ;;  %s829_s18 = scalar_lea.vmem %s1193_s25, 1024  ;;  %s969_s7 = smov [#allocation7]  }
  0x7a   : > { %688 = vmatpush1.bf16.msra.mxu0 %v687_v40  ;;  %v331_v51 = vld [vmem:[%s1134_s30 + $0x60] sm:$0xff]  ;;  %v333_v54 = vld [vmem:[%s1134_s30 + $0x70] sm:$0xff]  ;;  %v347_v62 = vsub.s32 2, %v338_v59  ;;  %v343_v63 = vsub.s32 1, %v338_v59  ;;  %v351_v0 = vsub.s32 3, %v338_v59  ;;  %p830_p13 = scmp.ne.s32.totalorder %s1193_s25, %s829_s18  ;;  %s833_s30 = sshll.u32 %s969_s7, 4  ;;  %s834_s30 = int_to_ptr.vmem [resolvable:$false] %s833_s30 }
  0x7b   : > { %696 = vmatpush1.bf16.msra.mxu1 %v695_v44  ;;  %v691_v53 = vpack.c.bf16 %v331_v51, %v327_v50  ;;  %690 = vmatprep.subr.bf16.mxu0 %v689_v48  ;;  %v699_v55 = vpack.c.bf16 %v333_v54, %v329_v52  ;;  %v317_v56 = vld [vmem:[#allocation3] sm:$0xff]  ;;  %v318_v57 = vld [vmem:[#allocation3 + $0x8] sm:$0xff]  ;;  %s835_s22 = scalar_lea.vmem %s834_s30, 2048  ;;  %p836_p4 = scmp.lt.s32.totalorder %s1193_s25, %s834_s30 }
  0x7c   : > { %698 = vmatprep.subr.bf16.mxu1 %v697_v49  ;;  %v335_v61 = vld [vmem:[%s1285_s23] sm:$0xf]  ;;  %p831_p0 = pnand %p830_p13, %p1080_p1  ;;  %p837_p5 = scmp.lt.s32.totalorder %s835_s22, %s829_s18 }
  0x7d   : > { %v340_v1 = vrot.slane %v335_v61, %v339_v60  ;;  %v348_v2 = vrot.slane %v335_v61, %v347_v62  ;;  %v344_v3 = vrot.slane %v335_v61, %v343_v63  ;;  %v352_v4 = vrot.slane %v335_v61, %v351_v0 }
  0x7e   : > { %692 = vmatpush1.bf16.msra.mxu0 %v691_v53  ;;  %p832_p2 = pneg %p831_p0  ;;  %p838_p6 = por %p837_p5, %p836_p4 }
  0x7f   : > { %700 = vmatpush1.bf16.msra.mxu1 %v699_v55 }
  0x80   : > { %p839_p7 = pnand %p838_p6, %p832_p2 }
  0x81   : > { %672 = vmatmul.mubr.msk.f32.vlgmr.msra.gmra.mrb[0].mxu0 %vm357_vm2, %v317_v56 }
  0x82   : > { %674 = vmatmul.mubr.msk.f32.vlgmr.msra.gmra.mrb[0].mxu1 %vm357_vm2, %v317_v56  ;;  %434 = vmatprep.mubr.f32.mxu0 %v968_v38 }
  0x83   : > { %511 = vmatprep.mubr.f32.mxu1 %v968_v38 }
  0x85   : > { %673 = vmatmul.mubr.msk.f32.gmra.mrb[2].mxu0 %vm357_vm2, %v318_v57 }
  0x86   : > { %675 = vmatmul.mubr.msk.f32.gmra.mrb[2].mxu1 %vm357_vm2, %v318_v57 }
 0x154   : > { %v430_v5 = vpop.f32.mrb[0].mxu0 }
 0x155   : > { %v431_v6 = vadd.f32 %v430_v5, %v340_v1  ;;  %v507_v7 = vpop.f32.mrb[0].mxu1  ;;  %v432_v8 = vpop.f32.mrb[1].mxu0 }
 0x156   : > { %v508_v9 = vadd.f32 %v507_v7, %v348_v2  ;;  %v433_v10 = vadd.f32 %v432_v8, %v344_v3  ;;  %v509_v11 = vpop.f32.mrb[1].mxu1 }
 0x157   : > { %518 = vst [vmem:[%s1136_s8] sm:$0xff] %v431_v6  ;;  %v510_v12 = vadd.f32 %v509_v11, %v352_v4 }
 0x158   : > { %520 = vst [vmem:[%s1136_s8 + $0x10] sm:$0xff] %v508_v9  ;;  %519 = vst [vmem:[%s1136_s8 + $0x8] sm:$0xff] %v433_v10  ;;  %v436_v13 = vpop.f32.mrb[2].mxu0 }
 0x159   : > { %521 = vst [vmem:[%s1136_s8 + $0x18] sm:$0xff] %v510_v12  ;;  %v437_v14 = vadd.f32 %v436_v13, %v340_v1  ;;  %v513_v15 = vpop.f32.mrb[2].mxu1  ;;  %v438_v16 = vpop.f32.mrb[3].mxu0 }
 0x15a   : > { %v514_v17 = vadd.f32 %v513_v15, %v348_v2  ;;  %v439_v18 = vadd.f32 %v438_v16, %v344_v3  ;;  %v515_v19 = vpop.f32.mrb[3].mxu1 }
 0x15b   : > { %522 = vst [vmem:[%s1136_s8 + $0x20] sm:$0xff] %v437_v14  ;;  %v516_v20 = vadd.f32 %v515_v19, %v352_v4 }
 0x15c   : > { %524 = vst [vmem:[%s1136_s8 + $0x30] sm:$0xff] %v514_v17  ;;  %523 = vst [vmem:[%s1136_s8 + $0x28] sm:$0xff] %v439_v18 }
 0x15d   : > { %525 = vst [vmem:[%s1136_s8 + $0x38] sm:$0xff] %v516_v20 }
 0x15e   : > { %842 = shalt.err (!%p839_p7)
}
 0x15f   : > { %s843_s8 = scalar_lea.hbm %s1191_s15, 1024  ;;  %s847_s24 = scalar_lea.hbm %s1263_s4, 4096 }
 0x160   : > { %p844_p8 = scmp.ne.s32.totalorder %s1191_s15, %s843_s8  ;;  %p848_p11 = scmp.lt.u32.totalorder %s1191_s15, %s1263_s4 }
 0x161   : > { %p849_p12 = scmp.lt.u32.totalorder %s847_s24, %s843_s8  ;;  %p851_p0 = scmp.lt.u32.totalorder %s843_s8, %s1191_s15 }
 0x162   : > { %p845_p9 = pnand %p844_p8, %p1080_p1 }
 0x163   : > { %p850_p13 = por %p849_p12, %p848_p11 }
 0x164   : > { %p846_p10 = pneg %p845_p9 }
 0x165   : > { %p852_p2 = por %p851_p0, %p850_p13 }
 0x167   : > { %p853_p4 = pnand %p852_p2, %p846_p10 }
 0x169   : > { %856 = shalt.err (!%p853_p4)
}
 0x16a   : > { %s970_s29 = smov 512   ;;  %s971_s2 = smov 1024  }
 0x16b   : > { %s972_s0 = smov 32  }
 0x16c   : > { %701 = dma.vmem_to_hbm [thread:$0]  (%p1080_p1), %s1193_s25, 1024, %s1191_s15, %s1201_s17, %s970_s29, %s971_s2, %s972_s0  }
 0x16d PF: > { %p707_p5 = scmp.ge.s32.totalorder %s953_s28, 2  ;;  %s558_s23 = sand.u32 1, %s917_s20  }
 0x16e   : > { %s559_s26 = scalar_lea.sflag [#allocation8], %s558_s23 }
 0x16f   : > { %p704_p6 = pnand %p707_p5, %p1087_p3 }
 0x171   : > { %912 = dma.done.wait (!%p704_p6), %s559_s26, 1024  }
 0x172   : > { %914 = vsyncadd (!%p704_p6), %s559_s26, 4294966272  ;;  %s23_s28 = sadd.s32 1, %s953_s28   ;;  %s1287_s27 = sld [smem:[#allocation11_spill]] }
 0x173   : > { %p20_p7 = scmp.ge.s32.totalorder %s23_s28, 6   ;;  %s1288_s0 = sld [smem:[#allocation18_spill]] }
 0x174   : > { %s1289_s22 = sld [smem:[#allocation12_spill]]  ;;  %s1290_s23 = sld [smem:[#allocation17_spill]] }
 0x175   : > { %s1291_s24 = sld [smem:[#allocation13_spill]]  ;;  %s1292_s25 = sld [smem:[#allocation14_spill]] }
 0x176   : > { %s1293_s26 = sld [smem:[#allocation15_spill]]  ;;  %s1294_s14 = sld [smem:[#allocation16_spill]] }
 0x177   : > { %s1295_s20 = smov %s921_s21  ;;  %22 = sbr.rel (!%p20_p7) target bundleno = 21 (0x15), region = 158 }
 0x178   : > { %s1296_s21 = smov %s1287_s27 }
 0x17c   : > { %s1297_s27 = smov %s1294_s14 }
 0x17e   :  { %564 = vsyncpa [#allocation8], 1 }
 0x17f   :  { %566 = vsyncpa [#allocation8 + $0x1], 1 }

</bundles_post_ra>
